<compile_context>
chip_gen: v5e
topology: v5e:2x2
jax: 0.10.0
libtpu: 0.0.40
codegen_flags: <defaults>
</compile_context>

<pallas_src>
import functools

import jax
import jax.numpy as jnp
from jax.experimental import pallas as pl
from jax.experimental.pallas import tpu as pltpu

_MASK_BIAS = -1e30  # large negative additive bias for masked positions


def _attention_kernel(x_ref, wq_ref, wk_ref, wv_ref, bq_ref, bk_ref, bv_ref,
                      wp_ref, bp_ref, bias_ref, o_ref, *,
                      num_heads: int, head_dim: int, mask_heads: int):
    """One batch element per grid step; all heads fused.

    x_ref:        (1, T, C)      bf16  (cast once in the wrapper)
    wq/wk/wv_ref: (C, C)         bf16  head-major columns; scale folded into wq
    bq/bk/bv_ref: (1, C)         f32   (scale folded into bq)
    wp_ref:       (C, C)         bf16  head-major rows
    bp_ref:       (1, C)         f32
    bias_ref:     (1, MH, T, T)  bf16  additive mask bias (0 keep / -1e30 mask)
    o_ref:        (1, T, C)      x.dtype
    """
    x_bf = x_ref[0]                                             # (T, C) bf16

    # Fused (all-head) Q/K/V projections: full-width MXU matmuls, f32 acc.
    q = jnp.dot(x_bf, wq_ref[...], preferred_element_type=jnp.float32) + bq_ref[0]
    k = jnp.dot(x_bf, wk_ref[...], preferred_element_type=jnp.float32) + bk_ref[0]
    v = jnp.dot(x_bf, wv_ref[...], preferred_element_type=jnp.float32) + bv_ref[0]

    # Cast once; reused by every per-head attention matmul below.
    q_bf = q.astype(jnp.bfloat16)
    k_bf = k.astype(jnp.bfloat16)
    v_bf = v.astype(jnp.bfloat16)

    outs = []
    for h in range(num_heads):
        sl = slice(h * head_dim, (h + 1) * head_dim)
        # Scores: (T, hd) x (T, hd) contracting head_dim -> (T, T), f32 acc.
        s = jax.lax.dot_general(
            q_bf[:, sl], k_bf[:, sl],
            (((1,), (1,)), ((), ())), preferred_element_type=jnp.float32)
        bias_h = bias_ref[0, h if mask_heads > 1 else 0]
        s = s + bias_h.astype(jnp.float32)                      # (T, T)

        # Numerically stable softmax in f32; defer normalization until after PV.
        p = jnp.exp(s - jnp.max(s, axis=-1, keepdims=True))
        l = jnp.sum(p, axis=-1, keepdims=True)                  # (T, 1)

        pv = jnp.dot(p.astype(jnp.bfloat16), v_bf[:, sl],
                     preferred_element_type=jnp.float32)        # (T, hd)
        outs.append(pv * pl.reciprocal(l, approx=True))         # EUP reciprocal

    # Concatenate heads (head-major feature layout) and do ONE full-width
    # output-projection matmul: (T, C) @ (C, C).
    y = jnp.concatenate(outs, axis=-1).astype(jnp.bfloat16)     # (T, C)
    out = jnp.dot(y, wp_ref[...], preferred_element_type=jnp.float32) + bp_ref[0]
    o_ref[0] = out.astype(o_ref.dtype)


def _vmem_limit_bytes() -> int:
    """Generation-aware VMEM budget (v7x: 64 MiB physical vs 128 MiB v5e/v6e)."""
    try:
        cap = int(pltpu.get_tpu_info().vmem_capacity_bytes)
        return max(16 * 1024 * 1024, (cap * 3) // 4)
    except Exception:
        return 32 * 1024 * 1024


def attention_forward(x, params, mask=None, *, num_heads: int):
    """Pallas equivalent of Attention.forward. x: (B, T, C)."""
    B, T, C = x.shape
    assert C % num_heads == 0
    hd = C // num_heads
    scale = hd ** -0.5

    # PyTorch Linear weight is (out_features, in_features); qkv output features
    # are ordered [q(C) | k(C) | v(C)], each head-major.  Transpose, split,
    # fold the softmax scale into the q weight/bias, cast weights to bf16.
    wqkv_t = jnp.asarray(params["wqkv"], jnp.float32).T         # (C, 3C)
    bqkv = jnp.asarray(params["bqkv"], jnp.float32)             # (3C,)

    wq = (wqkv_t[:, 0 * C:1 * C] * scale).astype(jnp.bfloat16)  # (C, C)
    wk = wqkv_t[:, 1 * C:2 * C].astype(jnp.bfloat16)
    wv = wqkv_t[:, 2 * C:3 * C].astype(jnp.bfloat16)
    bq = (bqkv[0 * C:1 * C] * scale).reshape(1, C)
    bk = bqkv[1 * C:2 * C].reshape(1, C)
    bv = bqkv[2 * C:3 * C].reshape(1, C)

    wp = jnp.asarray(params["wproj"], jnp.float32).T.astype(jnp.bfloat16)  # (C, C)
    bp = jnp.asarray(params["bproj"], jnp.float32).reshape(1, C)

    # Additive attention bias in bf16 (halves DMA/VMEM vs f32), kept at the
    # mask's natural broadcast extents so a shared causal mask is DMA'd once.
    if mask is None:
        bias = jnp.zeros((1, 1, T, T), jnp.bfloat16)
    else:
        m = jnp.asarray(mask)
        while m.ndim < 4:
            m = m[None]
        bias = jnp.where(m != 0, 0.0, _MASK_BIAS).astype(jnp.bfloat16)
    mb, mh = int(bias.shape[0]), int(bias.shape[1])
    assert bias.shape[2:] == (T, T)
    assert mb in (1, B) and mh in (1, num_heads)

    # Cast x to bf16 once in the wrapper (MXU input; halves the x HBM->VMEM DMA).
    x_bf = x.astype(jnp.bfloat16)

    kernel = functools.partial(_attention_kernel, num_heads=num_heads,
                               head_dim=hd, mask_heads=mh)

    const2 = lambda b: (0, 0)
    bias_idx = lambda b: (b if mb > 1 else 0, 0, 0, 0)

    return pl.pallas_call(
        kernel,
        out_shape=jax.ShapeDtypeStruct((B, T, C), x.dtype),
        grid=(B,),
        in_specs=[
            pl.BlockSpec((1, T, C), lambda b: (b, 0, 0)),       # x (bf16)
            pl.BlockSpec((C, C), const2),                       # wq (resident)
            pl.BlockSpec((C, C), const2),                       # wk (resident)
            pl.BlockSpec((C, C), const2),                       # wv (resident)
            pl.BlockSpec((1, C), const2),                       # bq
            pl.BlockSpec((1, C), const2),                       # bk
            pl.BlockSpec((1, C), const2),                       # bv
            pl.BlockSpec((C, C), const2),                       # wp (resident)
            pl.BlockSpec((1, C), const2),                       # bp
            pl.BlockSpec((1, mh, T, T), bias_idx),              # mask bias (bf16)
        ],
        out_specs=pl.BlockSpec((1, T, C), lambda b: (b, 0, 0)),
        compiler_params=pltpu.CompilerParams(
            dimension_semantics=("parallel",),
            vmem_limit_bytes=_vmem_limit_bytes()),
    )(x_bf, wq, wk, wv, bq, bk, bv, wp, bp, bias)


def variance_scaling_init(key, shape, scale):
    """Deterministic stand-in for variance_scaling_ (fan_in, truncated normal)."""
    if scale is None:
        scale = 1.0
    fan_in = shape[1]  # PyTorch Linear weight is (out_features, in_features)
    std = (scale / fan_in) ** 0.5
    return std * jax.random.truncated_normal(key, -2.0, 2.0, shape, jnp.float32)


def init_attention_params(key, dim: int, w_init_scale=None):
    k_qkv, k_proj = jax.random.split(key)
    return {
        "wqkv": variance_scaling_init(k_qkv, (3 * dim, dim), w_init_scale),
        "bqkv": jnp.zeros((3 * dim,), jnp.float32),
        "wproj": variance_scaling_init(k_proj, (dim, dim), w_init_scale),
        "bproj": jnp.zeros((dim,), jnp.float32),
    }


def attention_reference(x, params, mask, num_heads):
    """Pure-JAX (f32) transcription of the PyTorch forward, for verification."""
    B, T, C = x.shape
    hd = C // num_heads
    qkv = x @ params["wqkv"].T + params["bqkv"]
    qkv = qkv.reshape(B, T, 3, num_heads, hd).transpose(2, 0, 3, 1, 4)
    q, k, v = qkv[0], qkv[1], qkv[2]
    attn = jnp.einsum("bhtd,bhsd->bhts", q, k) * (hd ** -0.5)
    if mask is not None:
        neg = -jnp.finfo(attn.dtype).max
        attn = jnp.where(mask > 0, attn, neg)
    attn = jax.nn.softmax(attn, axis=-1)
    out = jnp.einsum("bhts,bhsd->bhtd", attn, v)
    out = out.transpose(0, 2, 1, 3).reshape(B, T, C)
    return out @ params["wproj"].T + params["bproj"]


if __name__ == "__main__":
    B, T, C, H = 2, 8, 32, 4

    key = jax.random.PRNGKey(0)
    k_x, k_params = jax.random.split(key)

    x = jax.random.normal(k_x, (B, T, C), jnp.float32)
    params = init_attention_params(k_params, C, w_init_scale=1.0)

    # Causal mask shared across batch and heads (exercises the masked path and
    # the shared-(1,1,T,T)-bias fast path).
    causal = jnp.tril(jnp.ones((T, T), jnp.float32))
    mask = causal[None, None]  # (1, 1, T, T)

    out = attention_forward(x, params, mask, num_heads=H)
    out = jax.block_until_ready(out)

    ref = attention_reference(x, params, mask, H)
    assert out.shape == (B, T, C)
    err = jnp.max(jnp.abs(out - ref))
    # Tolerance reflects bf16 MXU inputs (f32 accumulation) vs the f32 reference.
    assert jnp.allclose(out, ref, atol=1e-1, rtol=1e-1), f"max abs err {err}"

    print("KERNEL_OK")
</pallas_src>

<mosaic_0001>
module attributes {stable_mosaic.version = 11 : i64} {
  func.func @_attention_kernel(%arg0: i32, %arg1: memref<1x8x32xbf16, #tpu.memory_space<vmem>>, %arg2: memref<32x32xbf16, #tpu.memory_space<vmem>>, %arg3: memref<32x32xbf16, #tpu.memory_space<vmem>>, %arg4: memref<32x32xbf16, #tpu.memory_space<vmem>>, %arg5: memref<1x32xf32, #tpu.memory_space<vmem>>, %arg6: memref<1x32xf32, #tpu.memory_space<vmem>>, %arg7: memref<1x32xf32, #tpu.memory_space<vmem>>, %arg8: memref<32x32xbf16, #tpu.memory_space<vmem>>, %arg9: memref<1x32xf32, #tpu.memory_space<vmem>>, %arg10: memref<1x1x8x8xbf16, #tpu.memory_space<vmem>>, %arg11: memref<1x8x32xf32, #tpu.memory_space<vmem>>) attributes {dimension_semantics = [#tpu.dimension_semantics<parallel>], iteration_bounds = array<i64: 2>, scalar_prefetch = 0 : i64, scratch_operands = 0 : i64, tpu.core_type = #tpu.core_type<tc>, window_params = [{transform_indices = @transform_0, window_bounds = array<i64: 1, 8, 32>}, {pipeline_mode = #tpu.pipeline_mode<synchronous>, transform_indices = @transform_1, window_bounds = array<i64: 32, 32>}, {pipeline_mode = #tpu.pipeline_mode<synchronous>, transform_indices = @transform_2, window_bounds = array<i64: 32, 32>}, {pipeline_mode = #tpu.pipeline_mode<synchronous>, transform_indices = @transform_3, window_bounds = array<i64: 32, 32>}, {pipeline_mode = #tpu.pipeline_mode<synchronous>, transform_indices = @transform_4, window_bounds = array<i64: 1, 32>}, {pipeline_mode = #tpu.pipeline_mode<synchronous>, transform_indices = @transform_5, window_bounds = array<i64: 1, 32>}, {pipeline_mode = #tpu.pipeline_mode<synchronous>, transform_indices = @transform_6, window_bounds = array<i64: 1, 32>}, {pipeline_mode = #tpu.pipeline_mode<synchronous>, transform_indices = @transform_7, window_bounds = array<i64: 32, 32>}, {pipeline_mode = #tpu.pipeline_mode<synchronous>, transform_indices = @transform_8, window_bounds = array<i64: 1, 32>}, {pipeline_mode = #tpu.pipeline_mode<synchronous>, transform_indices = @transform_9, window_bounds = array<i64: 1, 1, 8, 8>}, {transform_indices = @transform_10, window_bounds = array<i64: 1, 8, 32>}]} {
    %c0 = arith.constant 0 : index
    %c0_0 = arith.constant 0 : index
    %c0_1 = arith.constant 0 : index
    %0 = vector.load %arg1[%c0, %c0_0, %c0_1] : memref<1x8x32xbf16, #tpu.memory_space<vmem>>, vector<1x8x32xbf16>
    %1 = vector.shape_cast %0 : vector<1x8x32xbf16> to vector<8x32xbf16>
    %c0_2 = arith.constant 0 : index
    %c0_3 = arith.constant 0 : index
    %2 = vector.load %arg2[%c0_2, %c0_3] : memref<32x32xbf16, #tpu.memory_space<vmem>>, vector<32x32xbf16>
    %cst = arith.constant dense<0.000000e+00> : vector<8x32xf32>
    %3 = tpu.matmul %1, %2, %cst {dimension_numbers = #tpu.dot_dimension_numbers<[1], [0], [0], [1], [0, 0, 1, 1], [], []>} : vector<8x32xbf16>, vector<32x32xbf16>, vector<8x32xf32> -> vector<8x32xf32>
    %c0_4 = arith.constant 0 : index
    %c0_5 = arith.constant 0 : index
    %4 = vector.load %arg5[%c0_4, %c0_5] : memref<1x32xf32, #tpu.memory_space<vmem>>, vector<1x32xf32>
    %5 = vector.shape_cast %4 : vector<1x32xf32> to vector<32xf32>
    %6 = vector.shape_cast %5 : vector<32xf32> to vector<1x32xf32>
    %7 = vector.broadcast %6 : vector<1x32xf32> to vector<8x32xf32>
    %8 = arith.addf %3, %7 : vector<8x32xf32>
    %c0_6 = arith.constant 0 : index
    %c0_7 = arith.constant 0 : index
    %9 = vector.load %arg3[%c0_6, %c0_7] : memref<32x32xbf16, #tpu.memory_space<vmem>>, vector<32x32xbf16>
    %cst_8 = arith.constant dense<0.000000e+00> : vector<8x32xf32>
    %10 = tpu.matmul %1, %9, %cst_8 {dimension_numbers = #tpu.dot_dimension_numbers<[1], [0], [0], [1], [0, 0, 1, 1], [], []>} : vector<8x32xbf16>, vector<32x32xbf16>, vector<8x32xf32> -> vector<8x32xf32>
    %c0_9 = arith.constant 0 : index
    %c0_10 = arith.constant 0 : index
    %11 = vector.load %arg6[%c0_9, %c0_10] : memref<1x32xf32, #tpu.memory_space<vmem>>, vector<1x32xf32>
    %12 = vector.shape_cast %11 : vector<1x32xf32> to vector<32xf32>
    %13 = vector.shape_cast %12 : vector<32xf32> to vector<1x32xf32>
    %14 = vector.broadcast %13 : vector<1x32xf32> to vector<8x32xf32>
    %15 = arith.addf %10, %14 : vector<8x32xf32>
    %c0_11 = arith.constant 0 : index
    %c0_12 = arith.constant 0 : index
    %16 = vector.load %arg4[%c0_11, %c0_12] : memref<32x32xbf16, #tpu.memory_space<vmem>>, vector<32x32xbf16>
    %cst_13 = arith.constant dense<0.000000e+00> : vector<8x32xf32>
    %17 = tpu.matmul %1, %16, %cst_13 {dimension_numbers = #tpu.dot_dimension_numbers<[1], [0], [0], [1], [0, 0, 1, 1], [], []>} : vector<8x32xbf16>, vector<32x32xbf16>, vector<8x32xf32> -> vector<8x32xf32>
    %c0_14 = arith.constant 0 : index
    %c0_15 = arith.constant 0 : index
    %18 = vector.load %arg7[%c0_14, %c0_15] : memref<1x32xf32, #tpu.memory_space<vmem>>, vector<1x32xf32>
    %19 = vector.shape_cast %18 : vector<1x32xf32> to vector<32xf32>
    %20 = vector.shape_cast %19 : vector<32xf32> to vector<1x32xf32>
    %21 = vector.broadcast %20 : vector<1x32xf32> to vector<8x32xf32>
    %22 = arith.addf %17, %21 : vector<8x32xf32>
    %23 = arith.truncf %8 : vector<8x32xf32> to vector<8x32xbf16>
    %24 = arith.truncf %15 : vector<8x32xf32> to vector<8x32xbf16>
    %25 = arith.truncf %22 : vector<8x32xf32> to vector<8x32xbf16>
    %26 = vector.extract_strided_slice %23 {offsets = [0, 0], sizes = [8, 8], strides = [1, 1]} : vector<8x32xbf16> to vector<8x8xbf16>
    %27 = vector.extract_strided_slice %24 {offsets = [0, 0], sizes = [8, 8], strides = [1, 1]} : vector<8x32xbf16> to vector<8x8xbf16>
    %cst_16 = arith.constant dense<0.000000e+00> : vector<8x8xf32>
    %28 = tpu.matmul %26, %27, %cst_16 {dimension_numbers = #tpu.dot_dimension_numbers<[1], [1], [0], [0], [0, 0, 1, 0], [], []>} : vector<8x8xbf16>, vector<8x8xbf16>, vector<8x8xf32> -> vector<8x8xf32>
    %c0_17 = arith.constant 0 : index
    %c0_18 = arith.constant 0 : index
    %c0_19 = arith.constant 0 : index
    %c0_20 = arith.constant 0 : index
    %29 = vector.load %arg10[%c0_17, %c0_18, %c0_19, %c0_20] : memref<1x1x8x8xbf16, #tpu.memory_space<vmem>>, vector<1x1x8x8xbf16>
    %30 = vector.shape_cast %29 : vector<1x1x8x8xbf16> to vector<8x8xbf16>
    %31 = arith.extf %30 : vector<8x8xbf16> to vector<8x8xf32>
    %32 = arith.addf %28, %31 : vector<8x8xf32>
    %cst_21 = arith.constant dense<0xFF800000> : vector<8xf32>
    %33 = vector.multi_reduction <maximumf>, %32, %cst_21 [1] : vector<8x8xf32> to vector<8xf32>
    %34 = vector.shape_cast %33 : vector<8xf32> to vector<8x1xf32>
    %35 = vector.broadcast %34 : vector<8x1xf32> to vector<8x8xf32>
    %36 = arith.subf %32, %35 : vector<8x8xf32>
    %37 = math.exp %36 : vector<8x8xf32>
    %cst_22 = arith.constant dense<0.000000e+00> : vector<8xf32>
    %38 = vector.multi_reduction <add>, %37, %cst_22 [1] : vector<8x8xf32> to vector<8xf32>
    %39 = vector.shape_cast %38 : vector<8xf32> to vector<8x1xf32>
    %40 = arith.truncf %37 : vector<8x8xf32> to vector<8x8xbf16>
    %41 = vector.extract_strided_slice %25 {offsets = [0, 0], sizes = [8, 8], strides = [1, 1]} : vector<8x32xbf16> to vector<8x8xbf16>
    %cst_23 = arith.constant dense<0.000000e+00> : vector<8x8xf32>
    %42 = tpu.matmul %40, %41, %cst_23 {dimension_numbers = #tpu.dot_dimension_numbers<[1], [0], [0], [1], [0, 0, 1, 1], [], []>} : vector<8x8xbf16>, vector<8x8xbf16>, vector<8x8xf32> -> vector<8x8xf32>
    %43 = tpu.reciprocal %39 {approx = true} : vector<8x1xf32> -> vector<8x1xf32>
    %44 = vector.broadcast %43 : vector<8x1xf32> to vector<8x8xf32>
    %45 = arith.mulf %42, %44 : vector<8x8xf32>
    %46 = vector.extract_strided_slice %23 {offsets = [0, 8], sizes = [8, 8], strides = [1, 1]} : vector<8x32xbf16> to vector<8x8xbf16>
    %47 = vector.extract_strided_slice %24 {offsets = [0, 8], sizes = [8, 8], strides = [1, 1]} : vector<8x32xbf16> to vector<8x8xbf16>
    %cst_24 = arith.constant dense<0.000000e+00> : vector<8x8xf32>
    %48 = tpu.matmul %46, %47, %cst_24 {dimension_numbers = #tpu.dot_dimension_numbers<[1], [1], [0], [0], [0, 0, 1, 0], [], []>} : vector<8x8xbf16>, vector<8x8xbf16>, vector<8x8xf32> -> vector<8x8xf32>
    %c0_25 = arith.constant 0 : index
    %c0_26 = arith.constant 0 : index
    %c0_27 = arith.constant 0 : index
    %c0_28 = arith.constant 0 : index
    %49 = vector.load %arg10[%c0_25, %c0_26, %c0_27, %c0_28] : memref<1x1x8x8xbf16, #tpu.memory_space<vmem>>, vector<1x1x8x8xbf16>
    %50 = vector.shape_cast %49 : vector<1x1x8x8xbf16> to vector<8x8xbf16>
    %51 = arith.extf %50 : vector<8x8xbf16> to vector<8x8xf32>
    %52 = arith.addf %48, %51 : vector<8x8xf32>
    %cst_29 = arith.constant dense<0xFF800000> : vector<8xf32>
    %53 = vector.multi_reduction <maximumf>, %52, %cst_29 [1] : vector<8x8xf32> to vector<8xf32>
    %54 = vector.shape_cast %53 : vector<8xf32> to vector<8x1xf32>
    %55 = vector.broadcast %54 : vector<8x1xf32> to vector<8x8xf32>
    %56 = arith.subf %52, %55 : vector<8x8xf32>
    %57 = math.exp %56 : vector<8x8xf32>
    %cst_30 = arith.constant dense<0.000000e+00> : vector<8xf32>
    %58 = vector.multi_reduction <add>, %57, %cst_30 [1] : vector<8x8xf32> to vector<8xf32>
    %59 = vector.shape_cast %58 : vector<8xf32> to vector<8x1xf32>
    %60 = arith.truncf %57 : vector<8x8xf32> to vector<8x8xbf16>
    %61 = vector.extract_strided_slice %25 {offsets = [0, 8], sizes = [8, 8], strides = [1, 1]} : vector<8x32xbf16> to vector<8x8xbf16>
    %cst_31 = arith.constant dense<0.000000e+00> : vector<8x8xf32>
    %62 = tpu.matmul %60, %61, %cst_31 {dimension_numbers = #tpu.dot_dimension_numbers<[1], [0], [0], [1], [0, 0, 1, 1], [], []>} : vector<8x8xbf16>, vector<8x8xbf16>, vector<8x8xf32> -> vector<8x8xf32>
    %63 = tpu.reciprocal %59 {approx = true} : vector<8x1xf32> -> vector<8x1xf32>
    %64 = vector.broadcast %63 : vector<8x1xf32> to vector<8x8xf32>
    %65 = arith.mulf %62, %64 : vector<8x8xf32>
    %66 = vector.extract_strided_slice %23 {offsets = [0, 16], sizes = [8, 8], strides = [1, 1]} : vector<8x32xbf16> to vector<8x8xbf16>
    %67 = vector.extract_strided_slice %24 {offsets = [0, 16], sizes = [8, 8], strides = [1, 1]} : vector<8x32xbf16> to vector<8x8xbf16>
    %cst_32 = arith.constant dense<0.000000e+00> : vector<8x8xf32>
    %68 = tpu.matmul %66, %67, %cst_32 {dimension_numbers = #tpu.dot_dimension_numbers<[1], [1], [0], [0], [0, 0, 1, 0], [], []>} : vector<8x8xbf16>, vector<8x8xbf16>, vector<8x8xf32> -> vector<8x8xf32>
    %c0_33 = arith.constant 0 : index
    %c0_34 = arith.constant 0 : index
    %c0_35 = arith.constant 0 : index
    %c0_36 = arith.constant 0 : index
    %69 = vector.load %arg10[%c0_33, %c0_34, %c0_35, %c0_36] : memref<1x1x8x8xbf16, #tpu.memory_space<vmem>>, vector<1x1x8x8xbf16>
    %70 = vector.shape_cast %69 : vector<1x1x8x8xbf16> to vector<8x8xbf16>
    %71 = arith.extf %70 : vector<8x8xbf16> to vector<8x8xf32>
    %72 = arith.addf %68, %71 : vector<8x8xf32>
    %cst_37 = arith.constant dense<0xFF800000> : vector<8xf32>
    %73 = vector.multi_reduction <maximumf>, %72, %cst_37 [1] : vector<8x8xf32> to vector<8xf32>
    %74 = vector.shape_cast %73 : vector<8xf32> to vector<8x1xf32>
    %75 = vector.broadcast %74 : vector<8x1xf32> to vector<8x8xf32>
    %76 = arith.subf %72, %75 : vector<8x8xf32>
    %77 = math.exp %76 : vector<8x8xf32>
    %cst_38 = arith.constant dense<0.000000e+00> : vector<8xf32>
    %78 = vector.multi_reduction <add>, %77, %cst_38 [1] : vector<8x8xf32> to vector<8xf32>
    %79 = vector.shape_cast %78 : vector<8xf32> to vector<8x1xf32>
    %80 = arith.truncf %77 : vector<8x8xf32> to vector<8x8xbf16>
    %81 = vector.extract_strided_slice %25 {offsets = [0, 16], sizes = [8, 8], strides = [1, 1]} : vector<8x32xbf16> to vector<8x8xbf16>
    %cst_39 = arith.constant dense<0.000000e+00> : vector<8x8xf32>
    %82 = tpu.matmul %80, %81, %cst_39 {dimension_numbers = #tpu.dot_dimension_numbers<[1], [0], [0], [1], [0, 0, 1, 1], [], []>} : vector<8x8xbf16>, vector<8x8xbf16>, vector<8x8xf32> -> vector<8x8xf32>
    %83 = tpu.reciprocal %79 {approx = true} : vector<8x1xf32> -> vector<8x1xf32>
    %84 = vector.broadcast %83 : vector<8x1xf32> to vector<8x8xf32>
    %85 = arith.mulf %82, %84 : vector<8x8xf32>
    %86 = vector.extract_strided_slice %23 {offsets = [0, 24], sizes = [8, 8], strides = [1, 1]} : vector<8x32xbf16> to vector<8x8xbf16>
    %87 = vector.extract_strided_slice %24 {offsets = [0, 24], sizes = [8, 8], strides = [1, 1]} : vector<8x32xbf16> to vector<8x8xbf16>
    %cst_40 = arith.constant dense<0.000000e+00> : vector<8x8xf32>
    %88 = tpu.matmul %86, %87, %cst_40 {dimension_numbers = #tpu.dot_dimension_numbers<[1], [1], [0], [0], [0, 0, 1, 0], [], []>} : vector<8x8xbf16>, vector<8x8xbf16>, vector<8x8xf32> -> vector<8x8xf32>
    %c0_41 = arith.constant 0 : index
    %c0_42 = arith.constant 0 : index
    %c0_43 = arith.constant 0 : index
    %c0_44 = arith.constant 0 : index
    %89 = vector.load %arg10[%c0_41, %c0_42, %c0_43, %c0_44] : memref<1x1x8x8xbf16, #tpu.memory_space<vmem>>, vector<1x1x8x8xbf16>
    %90 = vector.shape_cast %89 : vector<1x1x8x8xbf16> to vector<8x8xbf16>
    %91 = arith.extf %90 : vector<8x8xbf16> to vector<8x8xf32>
    %92 = arith.addf %88, %91 : vector<8x8xf32>
    %cst_45 = arith.constant dense<0xFF800000> : vector<8xf32>
    %93 = vector.multi_reduction <maximumf>, %92, %cst_45 [1] : vector<8x8xf32> to vector<8xf32>
    %94 = vector.shape_cast %93 : vector<8xf32> to vector<8x1xf32>
    %95 = vector.broadcast %94 : vector<8x1xf32> to vector<8x8xf32>
    %96 = arith.subf %92, %95 : vector<8x8xf32>
    %97 = math.exp %96 : vector<8x8xf32>
    %cst_46 = arith.constant dense<0.000000e+00> : vector<8xf32>
    %98 = vector.multi_reduction <add>, %97, %cst_46 [1] : vector<8x8xf32> to vector<8xf32>
    %99 = vector.shape_cast %98 : vector<8xf32> to vector<8x1xf32>
    %100 = arith.truncf %97 : vector<8x8xf32> to vector<8x8xbf16>
    %101 = vector.extract_strided_slice %25 {offsets = [0, 24], sizes = [8, 8], strides = [1, 1]} : vector<8x32xbf16> to vector<8x8xbf16>
    %cst_47 = arith.constant dense<0.000000e+00> : vector<8x8xf32>
    %102 = tpu.matmul %100, %101, %cst_47 {dimension_numbers = #tpu.dot_dimension_numbers<[1], [0], [0], [1], [0, 0, 1, 1], [], []>} : vector<8x8xbf16>, vector<8x8xbf16>, vector<8x8xf32> -> vector<8x8xf32>
    %103 = tpu.reciprocal %99 {approx = true} : vector<8x1xf32> -> vector<8x1xf32>
    %104 = vector.broadcast %103 : vector<8x1xf32> to vector<8x8xf32>
    %105 = arith.mulf %102, %104 : vector<8x8xf32>
    %106 = tpu.concatenate %45, %65, %85, %105 in 1 : vector<8x8xf32>, vector<8x8xf32>, vector<8x8xf32>, vector<8x8xf32> -> vector<8x32xf32>
    %107 = arith.truncf %106 : vector<8x32xf32> to vector<8x32xbf16>
    %c0_48 = arith.constant 0 : index
    %c0_49 = arith.constant 0 : index
    %108 = vector.load %arg8[%c0_48, %c0_49] : memref<32x32xbf16, #tpu.memory_space<vmem>>, vector<32x32xbf16>
    %cst_50 = arith.constant dense<0.000000e+00> : vector<8x32xf32>
    %109 = tpu.matmul %107, %108, %cst_50 {dimension_numbers = #tpu.dot_dimension_numbers<[1], [0], [0], [1], [0, 0, 1, 1], [], []>} : vector<8x32xbf16>, vector<32x32xbf16>, vector<8x32xf32> -> vector<8x32xf32>
    %c0_51 = arith.constant 0 : index
    %c0_52 = arith.constant 0 : index
    %110 = vector.load %arg9[%c0_51, %c0_52] : memref<1x32xf32, #tpu.memory_space<vmem>>, vector<1x32xf32>
    %111 = vector.shape_cast %110 : vector<1x32xf32> to vector<32xf32>
    %112 = vector.shape_cast %111 : vector<32xf32> to vector<1x32xf32>
    %113 = vector.broadcast %112 : vector<1x32xf32> to vector<8x32xf32>
    %114 = arith.addf %109, %113 : vector<8x32xf32>
    %c0_53 = arith.constant 0 : index
    %c0_54 = arith.constant 0 : index
    %c0_55 = arith.constant 0 : index
    %115 = vector.load %arg11[%c0_53, %c0_54, %c0_55] : memref<1x8x32xf32, #tpu.memory_space<vmem>>, vector<1x8x32xf32>
    %116 = vector.shape_cast %115 : vector<1x8x32xf32> to vector<8x32xf32>
    %117 = vector.shape_cast %114 : vector<8x32xf32> to vector<1x8x32xf32>
    tpu.vector_store %arg11[%c0_53, %c0_54, %c0_55], %117 {strides = array<i32>} : memref<1x8x32xf32, #tpu.memory_space<vmem>>, vector<1x8x32xf32>,
    return
  }
  func.func @transform_0(%arg0: i32) -> (i32, i32, i32) {
    %c0_i32 = arith.constant 0 : i32
    %c0_i32_0 = arith.constant 0 : i32
    %c0_i32_1 = arith.constant 0 : i32
    return %arg0, %c0_i32, %c0_i32_0 : i32, i32, i32
  }
  func.func @transform_1(%arg0: i32) -> (i32, i32) {
    %c0_i32 = arith.constant 0 : i32
    %c0_i32_0 = arith.constant 0 : i32
    %c0_i32_1 = arith.constant 0 : i32
    return %c0_i32, %c0_i32_0 : i32, i32
  }
  func.func @transform_2(%arg0: i32) -> (i32, i32) {
    %c0_i32 = arith.constant 0 : i32
    %c0_i32_0 = arith.constant 0 : i32
    %c0_i32_1 = arith.constant 0 : i32
    return %c0_i32, %c0_i32_0 : i32, i32
  }
  func.func @transform_3(%arg0: i32) -> (i32, i32) {
    %c0_i32 = arith.constant 0 : i32
    %c0_i32_0 = arith.constant 0 : i32
    %c0_i32_1 = arith.constant 0 : i32
    return %c0_i32, %c0_i32_0 : i32, i32
  }
  func.func @transform_4(%arg0: i32) -> (i32, i32) {
    %c0_i32 = arith.constant 0 : i32
    %c0_i32_0 = arith.constant 0 : i32
    %c0_i32_1 = arith.constant 0 : i32
    return %c0_i32, %c0_i32_0 : i32, i32
  }
  func.func @transform_5(%arg0: i32) -> (i32, i32) {
    %c0_i32 = arith.constant 0 : i32
    %c0_i32_0 = arith.constant 0 : i32
    %c0_i32_1 = arith.constant 0 : i32
    return %c0_i32, %c0_i32_0 : i32, i32
  }
  func.func @transform_6(%arg0: i32) -> (i32, i32) {
    %c0_i32 = arith.constant 0 : i32
    %c0_i32_0 = arith.constant 0 : i32
    %c0_i32_1 = arith.constant 0 : i32
    return %c0_i32, %c0_i32_0 : i32, i32
  }
  func.func @transform_7(%arg0: i32) -> (i32, i32) {
    %c0_i32 = arith.constant 0 : i32
    %c0_i32_0 = arith.constant 0 : i32
    %c0_i32_1 = arith.constant 0 : i32
    return %c0_i32, %c0_i32_0 : i32, i32
  }
  func.func @transform_8(%arg0: i32) -> (i32, i32) {
    %c0_i32 = arith.constant 0 : i32
    %c0_i32_0 = arith.constant 0 : i32
    %c0_i32_1 = arith.constant 0 : i32
    return %c0_i32, %c0_i32_0 : i32, i32
  }
  func.func @transform_9(%arg0: i32) -> (i32, i32, i32, i32) {
    %c0_i32 = arith.constant 0 : i32
    %c0_i32_0 = arith.constant 0 : i32
    %c0_i32_1 = arith.constant 0 : i32
    %c0_i32_2 = arith.constant 0 : i32
    %c0_i32_3 = arith.constant 0 : i32
    return %c0_i32, %c0_i32_0, %c0_i32_1, %c0_i32_2 : i32, i32, i32, i32
  }
  func.func @transform_10(%arg0: i32) -> (i32, i32, i32) {
    %c0_i32 = arith.constant 0 : i32
    %c0_i32_0 = arith.constant 0 : i32
    %c0_i32_1 = arith.constant 0 : i32
    return %arg0, %c0_i32, %c0_i32_0 : i32, i32, i32
  }
}

</mosaic_0001>

<bundles_post_ra>
// kernel: tpu_custom_call.1
= control target key start
LH: loop header
LB: loop body
LE: loop exit
PB: predicated region body
PF: predicated region fallthrough
CT: control target
= control target key end

     0   :  { %s1735_s0 = inlined_call_operand.hbm [shape: bf16[2,8,32], index: 0, kind: input, shape index: {}]   ;;  %s1736_s1 = inlined_call_operand.hbm [shape: bf16[32,32], index: 1, kind: input, shape index: {}]   ;;  %s1737_s2 = inlined_call_operand.hbm [shape: bf16[32,32], index: 2, kind: input, shape index: {}]   ;;  %s1738_s3 = inlined_call_operand.hbm [shape: bf16[32,32], index: 3, kind: input, shape index: {}]   ;;  %s1739_s4 = inlined_call_operand.vmem [shape: f32[1,32], index: 4, kind: input, shape index: {}]   ;;  %s1740_s5 = inlined_call_operand.vmem [shape: f32[1,32], index: 5, kind: input, shape index: {}]   ;;  %s1741_s6 = inlined_call_operand.vmem [shape: f32[1,32], index: 6, kind: input, shape index: {}]   ;;  %s1742_s7 = inlined_call_operand.hbm [shape: bf16[32,32], index: 7, kind: input, shape index: {}]   ;;  %s1743_s8 = inlined_call_operand.hbm [shape: f32[1,32], index: 8, kind: input, shape index: {}]   ;;  %s1744_s9 = inlined_call_operand.vmem [shape: bf16[1,1,8,8], index: 9, kind: input, shape index: {}]   ;;  %s1745_s10 = inlined_call_operand.hbm [shape: f32[2,8,32], index: 10, kind: output, shape index: {}]  }
   0x1   :  { %1746 = sst [smem:[#allocation19_spill]] %s1736_s1 }
   0x2   :  { %1747 = sst [smem:[#allocation20_spill]] %s1737_s2 }
   0x3   :  { %1748 = sst [smem:[#allocation21_spill]] %s1738_s3 }
   0x4   :  { %1749 = sst [smem:[#allocation22_spill]] %s1742_s7 }
   0x5   :  { %15 = vsyncpa [#allocation3], 0 }
   0x6   :  { %17 = vsyncpa [#allocation3 + $0x1], 0 }
   0x7   :  { %18 = vsyncpa [#allocation6], 0 }
   0x8   :  { %19 = vsyncpa [#allocation9], 0 }
   0x9   :  { %20 = vsyncpa [#allocation12], 0 }
   0xa   :  { %21 = vsyncpa [#allocation4], 0 }
   0xb   :  { %23 = vsyncpa [#allocation4 + $0x1], 0  ;;  %s1513_s13 = smov 0   ;;  %s1515_s14 = smov 0  }
   0xc   :  { %s1517_s15 = smov 0   ;;  %s1519_s16 = smov 0  }
   0xd LB: > { %s1750_s1 = sld [smem:[#allocation19_spill]]  ;;  %s1537_s20 = sadd.s32 4294967295, %s1443_s16   ;;  %s1443_s16 = sphi %s1519_s16, %s1764_s16   ;;  %s1439_s15 = sphi %s1517_s15, %s1763_s15   ;;  %s1435_s14 = sphi %s1515_s14, %s1762_s14   ;;  %s1431_s13 = sphi %s1513_s13, %s1761_s13  }
   0xe   : > { %p987_p0 = scmp.ge.s32.totalorder %s1443_s16, 1  ;;  %p50_p1 = scmp.eq.s32.totalorder %s1537_s20, 0 }
   0xf   : > { %p275_p2 = scmp.lt.s32.totalorder %s1443_s16, 3  ;;  %s1445_s22 = smov [#allocation5]  }
  0x10   : > { %s288_s23 = sshll.u32 %s1445_s22, 4  ;;  %s1752_s3 = sld [smem:[#allocation21_spill]]  ;;  %s289_s23 = int_to_ptr.vmem [resolvable:$true] %s288_s23 }
  0x11   : > { %p1542_p3 = pnand %p987_p0, %p275_p2  ;;  %s1754_s2 = sld [smem:[#allocation20_spill]] }
  0x12   : > { %s1446_s11 = smov [#allocation8]   ;;  %s1447_s17 = smov 64  }
  0x13   : > { %s286_s19 = sshll.u32 %s1750_s1, 4  ;;  %p1084_p4 = pneg %p1542_p3  ;;  %s287_s19 = int_to_ptr.hbm [resolvable:$true] %s286_s19 }
  0x14   : > { %s316_s12 = sshll.u32 %s1446_s11, 4  ;;  %s1448_s18 = smov 4   ;;  %s317_s12 = int_to_ptr.vmem [resolvable:$true] %s316_s12 }
  0x15   : > { %p1554_p6 = pnand %p1084_p4, %p50_p1  ;;  %s1755_s7 = sld [smem:[#allocation22_spill]] }
  0x16   : > { %s314_s26 = sshll.u32 %s1752_s3, 4  ;;  %s1449_s1 = smov [#allocation7]   ;;  %s315_s26 = int_to_ptr.hbm [resolvable:$true] %s314_s26 }
  0x17   : > { %s300_s30 = sshll.u32 %s1754_s2, 4  ;;  %s302_s28 = sshll.u32 %s1449_s1, 4  ;;  %s301_s30 = int_to_ptr.hbm [resolvable:$true] %s300_s30  ;;  %s303_s28 = int_to_ptr.vmem [resolvable:$true] %s302_s28 }
  0x18   : > { %1087 = dma.hbm_to_vmem [thread:$0]  (!%p1554_p6), %s287_s19, 256, %s289_s23, [#allocation6], %s1447_s17, %s1447_s17, %s1448_s18  }
  0x19   : > { %1093 = dma.hbm_to_vmem [thread:$0]  (!%p1554_p6), %s315_s26, 256, %s317_s12, [#allocation9], %s1447_s17, %s1447_s17, %s1448_s18  }
  0x1a   : > { %1090 = dma.hbm_to_vmem [thread:$0]  (!%p1554_p6), %s301_s30, 256, %s303_s28, [#allocation6], %s1447_s17, %s1447_s17, %s1448_s18  }
  0x1b   : > { %s337_s25 = sshll.u32 %s1755_s7, 4  ;;  %s1450_s19 = smov [#allocation10]   ;;  %s338_s25 = int_to_ptr.hbm [resolvable:$true] %s337_s25 }
  0x1c   : > { %s339_s23 = sshll.u32 %s1450_s19, 4  ;;  %s352_s11 = sshll.u32 %s1743_s8, 4  ;;  %s340_s23 = int_to_ptr.vmem [resolvable:$true] %s339_s23  ;;  %s353_s11 = int_to_ptr.hbm [resolvable:$true] %s352_s11 }
  0x1d   : > { %1096 = dma.hbm_to_vmem [thread:$0]  (!%p1554_p6), %s338_s25, 256, %s340_s23, [#allocation9], %s1447_s17, %s1447_s17, %s1448_s18  }
  0x1e   : > { %s1451_s1 = smov [#allocation11]   ;;  %s986_s30 = sadd.s32 4294967294, %s1443_s16  }
  0x1f   : > { %s354_s12 = sshll.u32 %s1451_s1, 4  ;;  %s1579_s22 = sadd.s32 1, %s1443_s16   ;;  %s355_s12 = int_to_ptr.vmem [resolvable:$true] %s354_s12 }
  0x20   : > { %1099 = dma.hbm_to_vmem [thread:$0]  (!%p1554_p6), %s353_s11, 16, %s355_s12, [#allocation12]  }
  0x21   : > { %s36_s24 = sadd.s32 1, %s1439_s15  ;;  %s33_s28 = ssub.s32 %s1443_s16, %s1579_s22 }
  0x22   : > { %p43_p7 = scmp.ne.s32.totalorder %s1439_s15, %s1435_s14  ;;  %p34_p8 = scmp.eq.s32.totalorder %s33_s28, 0 }
  0x23   : > { %p44_p9 = scmp.eq.s32.totalorder %s1443_s16, 0  ;;  %p49_p10 = scmp.ne.s32.totalorder %s1435_s14, %s1431_s13 }
  0x24   : > { %p262_p11 = scmp.eq.s32.totalorder %s1537_s20, 1  ;;  %p268_p0 = scmp.eq.s32.totalorder %s986_s30, 1 }
  0x25   : > { %s1591_s17 = scalar_select %p34_p8, %s1439_s15, %s36_s24  }
  0x26   : > { %p1595_p12 = por %p50_p1, %p49_p10  ;;  %p1599_p13 = por %p262_p11, %p43_p7 }
  0x27   : > { %p45_p2 = por %p44_p9, %p43_p7  ;;  %s368_s25 = sand.u32 1, %s1439_s15  }
  0x28   : > { %p1604_p4 = por %p268_p0, %p49_p10  ;;  %p1113_p6 = scmp.lt.s32.totalorder %s1443_s16, 2 }
  0x29   : > { %s994_s23 = sshll.u32 %s368_s25, 2  ;;  %s995_s26 = sshll.u32 %s1443_s16, 2 }
  0x2a   : > { %s376_s1 = scalar_lea.hbm %s1735_s0, %s995_s26  ;;  %s372_s24 = scalar_lea.vmem [#allocation2], %s994_s23 }
  0x2b   : > { %s378_s12 = sshll.u32 %s376_s1, 4  ;;  %s380_s28 = sshll.u32 %s372_s24, 4  ;;  %s379_s12 = int_to_ptr.hbm [resolvable:$true] %s378_s12  ;;  %s381_s28 = int_to_ptr.vmem [resolvable:$true] %s380_s28 }
  0x2c   : > { %p1613_p8 = pnand %p1113_p6, %p45_p2  ;;  %s369_s2 = scalar_lea.sflag [#allocation3], %s368_s25 }
  0x2d   : > { %s1335_s3 = sshra.s32 %s379_s12, 4  ;;  %s1342_s23 = scalar_lea.hbm %s1735_s0, 8  ;;  %s1336_s3 = int_to_ptr.hbm [resolvable:$true] %s1335_s3 }
  0x2e   : > { %s1337_s7 = scalar_lea.hbm %s1336_s3, 4  ;;  %p1339_p9 = pneg %p1613_p8 }
  0x2f   : > { %p1338_p7 = scmp.ne.s32.totalorder %s1336_s3, %s1337_s7  ;;  %p1343_p0 = scmp.lt.s32.totalorder %s1336_s3, %s1735_s0 }
  0x30   : > { %p1344_p2 = scmp.lt.s32.totalorder %s1342_s23, %s1337_s7 }
  0x31   : > { %p1340_p10 = pnand %p1339_p9, %p1338_p7 }
  0x32   : > { %p1345_p6 = por %p1344_p2, %p1343_p0 }
  0x33   : > { %p1341_p11 = pneg %p1340_p10 }
  0x35   : > { %p1346_p5 = pnand %p1345_p6, %p1341_p11 }
  0x37   : > { %1349 = shalt.err (!%p1346_p5)
}
  0x38   : > { %1103 = dma.hbm_to_vmem [thread:$0]  (!%p1613_p8), %s379_s12, 64, %s381_s28, %s369_s2  }
  0x39   : > { %389 = sbr.rel (%p1542_p3) target bundleno = 994 (0x3e2), region = 60  ;;  %s1630_s25 = sand.u32 (!%p1542_p3), 1, %s1435_s14  }
  0x3a   : > { %s997_s24 = sshll.u32 (!%p1542_p3), %s1630_s25, 2  ;;  %s392_s26 = scalar_lea.sflag (!%p1542_p3), [#allocation3], %s1630_s25 }
  0x3b   : > { %s395_s29 = scalar_lea.vmem (!%p1542_p3), [#allocation2], %s997_s24 }
  0x3e   : > { %1410 = dma.done.wait (%p1595_p12), %s392_s26, 64  }
  0x3f   : > { %1412 = vsyncadd (%p1595_p12), %s392_s26, 4294967232 }
  0x40   : > { %1414 = dma.done.wait (%p50_p1), [#allocation6], 512  }
  0x41   : > { %1416 = vsyncadd (%p50_p1), [#allocation6], 4294966784 }
  0x42   : > { %1418 = dma.done.wait (%p50_p1), [#allocation9], 512  }
  0x43   : > { %1420 = vsyncadd (%p50_p1), [#allocation9], 4294966784 }
  0x44   : > { %1422 = dma.done.wait (%p50_p1), [#allocation12], 16  }
  0x45   : > { %1424 = vsyncadd (%p50_p1), [#allocation12], 4294967280  ;;  %v1053_v0 = vld [vmem:[#allocation5 + $0x8] sm:$0xff]  ;;  %v1055_v1 = vld [vmem:[#allocation7 + $0x8] sm:$0xff]  ;;  %vm480_vm0 = vcmask 261120   ;;  %vm568_vm1 = vcmask 64512  }
  0x46   : > { %v1052_v2 = vld [vmem:[#allocation5] sm:$0xff]  ;;  %490 = vmatpush.bf16.msra.mxu0 %v1053_v0  ;;  %523 = vmatpush.bf16.msra.mxu1 %v1055_v1  ;;  %v1054_v3 = vld [vmem:[#allocation7] sm:$0xff]  ;;  %v459_v4 = vld [vmem:[%s395_s29] sm:$0xf]  ;;  %s1452_s27 = smov 112   ;;  %s1453_s12 = smov 120  }
  0x47   : > { %v1057_v5 = vld [vmem:[#allocation8 + $0x8] sm:$0xff]  ;;  %v1056_v6 = vld [vmem:[#allocation8] sm:$0xff]  ;;  %v1165_v7 = vld [vmem:[%s1739_s4] ss:$0 sm:$0xff]  ;;  %s1454_s28 = smov 104   ;;  %vm601_vm2 = vcmask 1043456  }
  0x48   : > { %556 = vmatpush.bf16.msra.mxu2 %v1057_v5  ;;  %v1166_v8 = vld [vmem:[%s1740_s5] ss:$0 sm:$0xff]  ;;  %s1455_s24 = smov 8   ;;  %s1456_s26 = smov 16   ;;  %vm810_vm3 = vcmask 130048   ;;  %vm812_vm4 = vcmask 195584  }
  0x49   : > { %v1167_v24 = vld [vmem:[%s1741_s6] ss:$0 sm:$0xff]  ;;  %s1457_s29 = smov 24   ;;  %s1049_s2 = sshll.u32 %s1537_s20, 3 }
  0x4a   : > { %491 = vmatpush.bf16.msra.mxu0 %v1052_v2  ;;  %524 = vmatpush.bf16.msra.mxu1 %v1054_v3  ;;  %v566_v38 = vld [vmem:[%s1744_s9] sm:$0xf]  ;;  %s1003_s3 = sshll.u32 %s1630_s25, 3  ;;  %s853_s23 = scalar_lea.sflag [#allocation4], %s1630_s25 }
  0x4b   : > { %v567_v39 = vunpack.c.l.bf16 %v566_v38 }
  0x4c   : > { %557 = vmatpush.bf16.msra.mxu2 %v1056_v6 }
  0x4d   : > { %1012 = vmatmul.msk.bf16.vlgmr.msra.gmra.mxu0 %vm480_vm0, %v459_v4  ;;  %1021 = vmatmul.msk.bf16.vlgmr.msra.gmra.mxu1 %vm480_vm0, %v459_v4 }
  0x4f   : > { %1030 = vmatmul.msk.bf16.vlgmr.msra.gmra.mxu2 %vm480_vm0, %v459_v4 }
  0xca   : > { %v493_v9 = vpop.f32.mrf.mxu0  ;;  %v526_v10 = vpop.f32.mrf.mxu1 }
  0xcb   : > { %v494_v11 = vadd.f32 %v1165_v7, %v493_v9  ;;  %v527_v12 = vadd.f32 %v1166_v8, %v526_v10 }
  0xcd   : > { %v563_v13 = vpack.c.bf16 %v494_v11, %v494_v11  ;;  %v564_v14 = vpack.c.bf16 %v527_v12, %v527_v12 }
  0xcf   : > { %v621_v15 = vunpack.c.l.b16 %v563_v13  ;;  %v626_v16 = vunpack.c.l.b16 %v564_v14  ;;  %v573_v17 = vsel %vm568_vm1, %v564_v14, 0 }
  0xd0   : > { %582 = vmatpush.bf16.xpose.msra.mxu3 %v573_v17 }
  0xd1   : > { %v622_v18 = vpack.c.b16 %v621_v15, %v621_v15  ;;  %v627_v19 = vpack.c.b16 %v626_v16, %v626_v16 }
  0xd2   : > { %v495_v20 = vpop.f32.mrf.mxu0  ;;  %v528_v21 = vpop.f32.mrf.mxu1 }
  0xd3   : > { %687 = vrot.lane.b32.xlu1 %v627_v19, %s1452_s27  ;;  %628 = vrot.lane.b32.xlu0 %v627_v19, %s1453_s12  ;;  %v559_v27 = vpop.f32.mrf.mxu2 }
  0xd4   : > { %685 = vrot.lane.b32.xlu2 %v622_v18, %s1452_s27  ;;  %v560_v28 = vadd.f32 %v1167_v24, %v559_v27 }
  0xd6   : > { %v565_v29 = vpack.c.bf16 %v560_v28, %v560_v28 }
  0xd7   : > { %1031 = vmatmul.msk.bf16.vlgmr.msra.gmra.mxu3 %vm568_vm1, %v563_v13 }
  0xd8   : > { %v660_v33 = vunpack.c.l.b16 %v565_v29  ;;  %v603_v34 = vsel %vm601_vm2, %v565_v29, 0 }
  0xd9   : > { %612 = vmatpush.bf16.msrb.mxu0 %v603_v34 }
  0xda   : > { %v661_v36 = vpack.c.b16 %v660_v33, %v660_v33 }
  0xdb   : > { %743 = vrot.lane.b32.xlu1 %v627_v19, %s1454_s28  ;;  %623 = vrot.lane.b32.xlu0 %v622_v18, %s1453_s12  ;;  %v561_v37 = vpop.f32.mrf.mxu2 }
  0xdc   : > { %741 = vrot.lane.b32.xlu2 %v622_v18, %s1454_s28 }
  0xe4   : > { %662 = vrot.lane.b32.xlu2 %v661_v36, %s1453_s12  ;;  %s457_s12 = scalar_lea.vmem [#allocation13], %s1003_s3 }
 0x12e   : > { %v686_v30 = vpop.permute.xlu2 %685 }
 0x136   : > { %v742_v42 = vpop.permute.xlu2 %741 }
 0x13e   : > { %v663_v55 = vpop.permute.xlu2 %662 }
 0x13f   : > { %v668_v56 = vsel %vm601_vm2, %v663_v55, 0 }
 0x140   : > { %677 = vmatpush.bf16.msrb.mxu2 %v668_v56 }
 0x145   : > { %v688_v22 = vpop.permute.xlu1 %687  ;;  %v629_v23 = vpop.permute.xlu0 %628 }
 0x146   : > { %v634_v25 = vsel %vm568_vm1, %v629_v23, 0  ;;  %v693_v26 = vsel %vm568_vm1, %v688_v22, 0 }
 0x147   : > { %643 = vmatpush.bf16.xpose.msrb.mxu1 %v634_v25  ;;  %702 = vmatpush.bf16.xpose.msrb.mxu3 %v693_v26 }
 0x14d   : > { %v744_v31 = vpop.permute.xlu1 %743  ;;  %v624_v32 = vpop.permute.xlu0 %623 }
 0x14e   : > { %v749_v35 = vsel %vm568_vm1, %v744_v31, 0  ;;  %1033 = vmatmul.msk.bf16.vlgmr.msrb.gmra.mxu1 %vm568_vm1, %v624_v32  ;;  %1035 = vmatmul.msk.bf16.vlgmr.msrb.gmra.mxu3 %vm568_vm1, %v686_v30 }
 0x14f   : > { %758 = vmatpush.bf16.xpose.msra.mxu1 %v749_v35 }
 0x15a   : > { %v584_v40 = vpop.f32.mrf.mxu3 }
 0x15b   : > { %v585_v41 = vadd.f32 %v584_v40, %v567_v39  ;;  %v1059_v40 = vld [vmem:[#allocation10 + $0x8] sm:$0xff] }
 0x15c   : > { %844 = vmatpush.bf16.msra.mxu3 %v1059_v40 }
 0x15d   : > { %v588_v43 = vsel %vm568_vm1, %v585_v41, -inf }
 0x15e   : > { %1037 = vmatmul.msk.bf16.vlgmr.msra.gmra.mxu1 %vm568_vm1, %v742_v42  ;;  %589 = vmax.xlane.f32.xlu1 %v588_v43 }
 0x162   : > { %v586_v44 = vpop.f32.mrf.mxu3 }
 0x177   : > { %774 = vrot.lane.b32.xlu1 %v661_v36, %s1454_s28  ;;  %s865_s28 = sshll.u32 %s457_s12, 4  ;;  %s866_s28 = int_to_ptr.vmem [resolvable:$true] %s865_s28 }
 0x1cb   : > { %v645_v45 = vpop.f32.mrf.mxu1 }
 0x1cc   : > { %v646_v46 = vadd.f32 %v645_v45, %v567_v39 }
 0x1ce   : > { %v649_v47 = vsel %vm568_vm1, %v646_v46, -inf }
 0x1cf   : > { %650 = vmax.xlane.f32.xlu0 %v649_v47 }
 0x1d1   : > { %v704_v48 = vpop.f32.mrf.mxu3  ;;  %v590_v49 = vpop.xlane.xlu1 %589 }
 0x1d2   : > { %v705_v50 = vadd.f32 %v704_v48, %v567_v39  ;;  %v591_v51 = vsub.f32 %v585_v41, %v590_v49  ;;  %v1058_v41 = vld [vmem:[#allocation10] sm:$0xff] }
 0x1d3   : > { %v647_v52 = vpop.f32.mrf.mxu1  ;;  %845 = vmatpush.bf16.msra.mxu3 %v1058_v41 }
 0x1d4   : > { %v592_v53 = vmul.f32 1.442695, %v591_v51  ;;  %v708_v54 = vsel %vm568_vm1, %v705_v50, -inf  ;;  %v1168_v52 = vld [vmem:[#allocation11] ss:$0 sm:$0xff] }
 0x1d6   : > { %1169 = vpow2.f32 %v592_v53 }
 0x1d7   : > { %709 = vmax.xlane.f32.xlu0 %v708_v54 }
 0x1d9   : > { %v706_v57 = vpop.f32.mrf.mxu3 }
 0x1db   : > { %v760_v58 = vpop.f32.mrf.mxu1 }
 0x1dc   : > { %v1170_v59 = vpop.eup %1169  ;;  %v761_v60 = vadd.f32 %v760_v58, %v567_v39 }
 0x1dd   : > { %v594_v61 = vsel %vm568_vm1, %v1170_v59, 0.0  ;;  %v597_v62 = vpack.c.bf16 %v1170_v59, %v1170_v59 }
 0x1de   : > { %595 = vadd.xlane.f32.xlu1 %v594_v61  ;;  %v764_v63 = vsel %vm568_vm1, %v761_v60, -inf }
 0x1df   : > { %765 = vmax.xlane.f32.xlu2 %v764_v63  ;;  %1032 = vmatmul.msk.bf16.vlgmr.msrb.gmra.mxu0 %vm568_vm1, %v597_v62 }
 0x1e3   : > { %v762_v0 = vpop.f32.mrf.mxu1 }
 0x1e9   : > { %v775_v1 = vpop.permute.xlu1 %774 }
 0x1ea   : > { %v780_v2 = vsel %vm601_vm2, %v775_v1, 0 }
 0x1eb   : > { %789 = vmatpush.bf16.msra.mxu2 %v780_v2 }
 0x1f7   : > { %718 = vrot.lane.b32.xlu2 %v661_v36, %s1452_s27  ;;  %s863_s27 = scalar_lea.hbm %s1745_s10, %s1049_s2 }
 0x1f8   : > { %s867_s30 = sshll.u32 %s863_s27, 4  ;;  %s868_s30 = int_to_ptr.hbm [resolvable:$true] %s867_s30 }
 0x1f9   : > { %s1379_s11 = sshra.s32 %s868_s30, 4  ;;  %s1380_s11 = int_to_ptr.hbm [resolvable:$true] %s1379_s11 }
 0x1fa   : > { %s1381_s20 = scalar_lea.hbm %s1380_s11, 8  ;;  %p1386_p12 = scmp.lt.s32.totalorder %s1380_s11, %s1745_s10 }
 0x1fb   : > { %p1382_p1 = scmp.ne.s32.totalorder %s1380_s11, %s1381_s20 }
 0x1fd   : > { %p1383_p3 = pnand %p1382_p1, %p1599_p13 }
 0x1ff   : > { %p1384_p5 = pneg %p1383_p3 }
 0x242   : > { %v651_v3 = vpop.xlane.xlu0 %650 }
 0x243   : > { %v652_v4 = vsub.f32 %v646_v46, %v651_v3 }
 0x245   : > { %v653_v5 = vmul.f32 1.442695, %v652_v4 }
 0x247   : > { %1171 = vpow2.f32 %v653_v5 }
 0x24a   : > { %v710_v6 = vpop.xlane.xlu0 %709 }
 0x24b   : > { %v711_v7 = vsub.f32 %v705_v50, %v710_v6 }
 0x24d   : > { %v1172_v8 = vpop.eup %1171  ;;  %v712_v9 = vmul.f32 1.442695, %v711_v7 }
 0x24e   : > { %v655_v10 = vsel %vm568_vm1, %v1172_v8, 0.0  ;;  %v658_v11 = vpack.c.bf16 %v1172_v8, %v1172_v8 }
 0x24f   : > { %1173 = vpow2.f32 %v712_v9  ;;  %656 = vadd.xlane.f32.xlu0 %v655_v10 }
 0x250   : > { %1034 = vmatmul.msk.bf16.vlgmr.msrb.gmra.mxu2 %vm568_vm1, %v658_v11 }
 0x251   : > { %v596_v42 = vpop.xlane.xlu1 %595 }
 0x252   : > { %v766_v12 = vpop.xlane.xlu2 %765 }
 0x253   : > { %v767_v13 = vsub.f32 %v761_v60, %v766_v12 }
 0x255   : > { %v1174_v14 = vpop.eup %1173  ;;  %v768_v15 = vmul.f32 1.442695, %v767_v13 }
 0x256   : > { %v714_v16 = vsel %vm568_vm1, %v1174_v14, 0.0  ;;  %v717_v21 = vpack.c.bf16 %v1174_v14, %v1174_v14 }
 0x257   : > { %1175 = vpow2.f32 %v768_v15  ;;  %715 = vadd.xlane.f32.xlu0 %v714_v16 }
 0x25a   : > { %v719_v17 = vpop.permute.xlu2 %718 }
 0x25b   : > { %v724_v18 = vsel %vm601_vm2, %v719_v17, 0 }
 0x25c   : > { %v614_v19 = vpop.f32.mrf.mxu0  ;;  %733 = vmatpush.bf16.msra.mxu0 %v724_v18 }
 0x25d   : > { %v1176_v20 = vpop.eup %1175 }
 0x25e   : > { %v773_v22 = vpack.c.bf16 %v1176_v20, %v1176_v20  ;;  %v770_v23 = vsel %vm568_vm1, %v1176_v20, 0.0 }
 0x25f   : > { %771 = vadd.xlane.f32.xlu0 %v770_v23  ;;  %1036 = vmatmul.msk.bf16.vlgmr.msra.gmra.mxu0 %vm568_vm1, %v717_v21 }
 0x260   : > { %1038 = vmatmul.msk.bf16.vlgmr.msra.gmra.mxu2 %vm568_vm1, %v773_v22 }
 0x264   : > { %v616_v24 = vpop.f32.mrf.mxu0 }
 0x2c2   : > { %v657_v25 = vpop.xlane.xlu0 %656 }
 0x2c3   : > { %1177 = vrcp.f32 %v657_v25 }
 0x2c9   : > { %v1178_v27 = vpop.eup %1177 }
 0x2ca   : > { %v716_v26 = vpop.xlane.xlu0 %715 }
 0x2cb   : > { %1179 = vrcp.f32 %v716_v26 }
 0x2d1   : > { %v1180_v32 = vpop.eup %1179 }
 0x2d2   : > { %v772_v30 = vpop.xlane.xlu0 %771 }
 0x2d3   : > { %v679_v28 = vpop.f32.mrf.mxu2  ;;  %1181 = vrcp.f32 %v772_v30 }
 0x2d4   : > { %v684_v29 = vmul.f32 %v1178_v27, %v679_v28  ;;  %1183 = vrcp.f32 %v596_v42 }
 0x2d6   : > { %798 = vrot.lane.b32.xlu2 %v684_v29, %s1455_s24 }
 0x2d9   : > { %v1182_v35 = vpop.eup %1181 }
 0x2da   : > { %v1184_v44 = vpop.eup %1183 }
 0x2db   : > { %v681_v31 = vpop.f32.mrf.mxu2  ;;  %v619_v45 = vmul.f32 %v1184_v44, %v614_v19 }
 0x2dc   : > { %v735_v33 = vpop.f32.mrf.mxu0 }
 0x2dd   : > { %v740_v34 = vmul.f32 %v1180_v32, %v735_v33 }
 0x2df   : > { %802 = vrot.lane.b32.xlu0 %v740_v34, %s1456_s26  ;;  %s1385_s26 = scalar_lea.hbm %s1745_s10, 16 }
 0x2e0   : > { %p1387_p8 = scmp.lt.s32.totalorder %s1385_s26, %s1381_s20 }
 0x2e2   : > { %p1388_p7 = por %p1387_p8, %p1386_p12 }
 0x2e3   : > { %v791_v36 = vpop.f32.mrf.mxu2 }
 0x2e4   : > { %v796_v37 = vmul.f32 %v1182_v35, %v791_v36  ;;  %v737_v38 = vpop.f32.mrf.mxu0  ;;  %p1389_p9 = pnand %p1388_p7, %p1384_p5 }
 0x2e6   : > { %806 = vrot.lane.b32.xlu2 %v796_v37, %s1457_s29 }
 0x2eb   : > { %v793_v39 = vpop.f32.mrf.mxu2 }
 0x330   : > { %v799_v43 = vpop.permute.xlu2 %798 }
 0x331   : > { %v809_v46 = vsel %vm568_vm1, %v619_v45, %v799_v43 }
 0x340   : > { %v807_v48 = vpop.permute.xlu2 %806 }
 0x351   : > { %v803_v47 = vpop.permute.xlu0 %802 }
 0x352   : > { %v811_v49 = vsel %vm810_vm3, %v809_v46, %v803_v47 }
 0x353   : > { %v813_v50 = vsel %vm812_vm4, %v811_v49, %v807_v48 }
 0x354   : > { %v814_v51 = vpack.c.bf16 %v813_v50, %v813_v50 }
 0x356   : > { %1047 = vmatmul.msk.bf16.vlgmr.msra.gmra.mxu3 %vm480_vm0, %v814_v51 }
 0x3d9   : > { %v847_v53 = vpop.f32.mrf.mxu3 }
 0x3da   : > { %v848_v54 = vadd.f32 %v1168_v52, %v847_v53 }
 0x3dc   : > { %851 = vst.msk [vmem:[%s457_s12] sm:$0xff] %vm480_vm0, %v848_v54 }
 0x3dd   : > { %1392 = shalt.err (!%p1389_p9)
}
 0x3de   : > { %1082 = dma.vmem_to_hbm [thread:$0]  (%p1599_p13), %s866_s28, 128, %s868_s30, %s853_s23  }
 0x3e1   : > { %v849_v55 = vpop.f32.mrf.mxu3 }
 0x3e2 PF: > { %s879_s25 = sand.u32 1, %s1431_s13   ;;  %p1760_p10 = scmp.ge.s32.totalorder %s1443_s16, 2 }
 0x3e3   : > { %s880_s3 = scalar_lea.sflag [#allocation4], %s879_s25 }
 0x3e4   : > { %p1105_p11 = pnand %p1760_p10, %p1604_p4 }
 0x3e6   : > { %p1106_p0 = pneg %p1105_p11 }
 0x3e8   : > { %1426 = dma.done.wait (%p1106_p0), %s880_s3, 128  }
 0x3e9   : > { %1428 = vsyncadd (%p1106_p0), %s880_s3, 4294967168  ;;  %p26_p2 = scmp.ge.s32.totalorder %s1579_s22, 4   ;;  %s1761_s13 = smov %s1435_s14 }
 0x3ea   : > { %s1762_s14 = smov %s1439_s15  ;;  %s1763_s15 = smov %s1591_s17 }
 0x3eb   : > { %s1764_s16 = smov %s1579_s22  ;;  %28 = sbr.rel (!%p26_p2) target bundleno = 13 (0xd), region = 125 }
 0x3f0   :  { %886 = vsyncpa [#allocation3], 1 }
 0x3f1   :  { %888 = vsyncpa [#allocation3 + $0x1], 1 }
 0x3f2   :  { %889 = vsyncpa [#allocation6], 1 }
 0x3f3   :  { %890 = vsyncpa [#allocation9], 1 }
 0x3f4   :  { %891 = vsyncpa [#allocation12], 1 }
 0x3f5   :  { %892 = vsyncpa [#allocation4], 1 }
 0x3f6   :  { %894 = vsyncpa [#allocation4 + $0x1], 1 }

</bundles_post_ra>
